<compile_context>
chip_gen: v5e
topology: v5e:2x2
jax: 0.10.0
libtpu: 0.0.40
codegen_flags: <defaults>
</compile_context>

<pallas_src>
import math

import jax
import jax.numpy as jnp
from jax.experimental import pallas as pl
from jax.experimental.pallas import tpu as pltpu


def token_embed_kernel(x_ref, w_ref, o_ref):
    # x_ref: (TM, 3*c_in)  fused (prev|cur|next) channel block
    # w_ref: (3*c_in, TN)  fused conv taps
    # o_ref: (TM, TN)
    o_ref[...] = jnp.dot(
        x_ref[...], w_ref[...], preferred_element_type=jnp.float32
    ).astype(o_ref.dtype)


def token_embedding(x, weight, *, tm=1024, tn=None, io_dtype=None):
    """x: [B, L, c_in]; weight: [d_model, c_in, 3] (PyTorch Conv1d layout).

    Returns [B, L, d_model], identical to
    nn.Conv1d(c_in, d_model, 3, padding=1, padding_mode='circular', bias=False)
    applied to x.permute(0, 2, 1) and transposed back.
    If io_dtype is given (e.g. jnp.bfloat16), inputs/outputs use that dtype
    while the MXU still accumulates in f32.
    """
    B, L, c_in = x.shape
    d_model = weight.shape[0]
    M = B * L
    K = 3 * c_in

    # Circular k=3 conv as one matmul with contraction width 3*c_in.
    # Tap 0 -> x[l-1], tap 1 -> x[l], tap 2 -> x[l+1] (PyTorch circular pad=1).
    x_prev = jnp.roll(x, 1, axis=1)
    x_next = jnp.roll(x, -1, axis=1)
    x_cat = jnp.concatenate([x_prev, x, x_next], axis=-1).reshape(M, K)
    w = jnp.transpose(weight, (2, 1, 0)).reshape(K, d_model)  # [3*c_in, d_model]

    if io_dtype is not None:
        x_cat = x_cat.astype(io_dtype)
        w = w.astype(io_dtype)
    out_dtype = x_cat.dtype
    itemsize = jnp.dtype(out_dtype).itemsize
    sub = {4: 8, 2: 16, 1: 32}.get(itemsize, 8)  # dtype-aware sublane multiple

    # tn: prefer full d_model (weight resident, fetched once, full-lane stores).
    if tn is None:
        tn = d_model if d_model <= 1024 else 512
    tn = min(tn, d_model)
    if tn < d_model:
        tn = max(128, (tn // 128) * 128)

    tm = min(tm, M)
    if tm < M:
        tm = max(sub, (tm // sub) * sub)

    # Budget double-buffered VMEM footprint to ~24 MiB (fits v7x's 64 MiB).
    budget = 24 * 1024 * 1024

    def _footprint(_tm):
        return 2 * itemsize * (_tm * K + K * tn + _tm * tn)

    while tm > sub and _footprint(tm) > budget:
        tm = max(sub, ((tm // 2) // sub) * sub)

    cost = pl.CostEstimate(
        flops=2 * M * K * d_model,
        transcendentals=0,
        bytes_accessed=itemsize * (M * K + K * d_model + M * d_model),
    )

    if tn == d_model:
        # 1-D grid over M: weight block index is constant -> DMA'd once.
        grid = (pl.cdiv(M, tm),)
        in_specs = [
            pl.BlockSpec((tm, K), lambda i: (i, 0)),
            pl.BlockSpec((K, tn), lambda i: (0, 0)),
        ]
        out_specs = pl.BlockSpec((tm, tn), lambda i: (i, 0))
        dim_sem = ("parallel",)
    else:
        # 2-D grid, d_model innermost so the x tile is not re-fetched.
        grid = (pl.cdiv(M, tm), pl.cdiv(d_model, tn))
        in_specs = [
            pl.BlockSpec((tm, K), lambda i, j: (i, 0)),
            pl.BlockSpec((K, tn), lambda i, j: (0, j)),
        ]
        out_specs = pl.BlockSpec((tm, tn), lambda i, j: (i, j))
        dim_sem = ("parallel", "parallel")

    out = pl.pallas_call(
        token_embed_kernel,
        out_shape=jax.ShapeDtypeStruct((M, d_model), out_dtype),
        grid_spec=pl.GridSpec(grid=grid, in_specs=in_specs, out_specs=out_specs),
        compiler_params=pltpu.CompilerParams(
            dimension_semantics=dim_sem,
            vmem_limit_bytes=32 * 1024 * 1024,
        ),
        cost_estimate=cost,
    )(x_cat, w)

    return out.reshape(B, L, d_model)


def _reference(x, weight):
    # Pure-JAX reference of the circular conv (for correctness check).
    w = jnp.transpose(weight, (2, 1, 0))  # [3, c_in, d_model]
    x_prev = jnp.roll(x, 1, axis=1)
    x_next = jnp.roll(x, -1, axis=1)
    return (
        jnp.einsum("blc,cd->bld", x_prev, w[0])
        + jnp.einsum("blc,cd->bld", x, w[1])
        + jnp.einsum("blc,cd->bld", x_next, w[2])
    )


if __name__ == "__main__":
    B, L, c_in, d_model = 2, 8, 4, 32

    key = jax.random.PRNGKey(0)
    kx, kw = jax.random.split(key)

    x = jax.random.normal(kx, (B, L, c_in), dtype=jnp.float32)

    # Deterministic kaiming_normal_(mode='fan_in', nonlinearity='leaky_relu')
    # for Conv1d weight [d_model, c_in, 3]: fan_in = c_in*3,
    # gain = sqrt(2/(1+0.01^2)), std = gain/sqrt(fan_in).
    fan_in = c_in * 3
    gain = math.sqrt(2.0 / (1.0 + 0.01 ** 2))
    std = gain / math.sqrt(fan_in)
    weight = std * jax.random.normal(kw, (d_model, c_in, 3), dtype=jnp.float32)

    ref = _reference(x, weight)

    # f32 path.
    out = jax.block_until_ready(token_embedding(x, weight))
    assert out.shape == (B, L, d_model)
    assert jnp.allclose(out, ref, atol=1e-5, rtol=1e-5)

    # bf16 I/O path (f32 accumulation on the MXU), loose tolerance.
    out_bf16 = jax.block_until_ready(
        token_embedding(x, weight, io_dtype=jnp.bfloat16)
    )
    assert out_bf16.shape == (B, L, d_model)
    assert jnp.allclose(out_bf16.astype(jnp.float32), ref, atol=5e-2, rtol=5e-2)

    print("KERNEL_OK")
</pallas_src>

<mosaic_0001>
module attributes {stable_mosaic.version = 11 : i64} {
  func.func @token_embed_kernel(%arg0: i32, %arg1: memref<16x12xf32, #tpu.memory_space<vmem>>, %arg2: memref<12x32xf32, #tpu.memory_space<vmem>>, %arg3: memref<16x32xf32, #tpu.memory_space<vmem>>) attributes {dimension_semantics = [#tpu.dimension_semantics<parallel>], iteration_bounds = array<i64: 1>, scalar_prefetch = 0 : i64, scratch_operands = 0 : i64, tpu.core_type = #tpu.core_type<tc>, window_params = [{transform_indices = @transform_0, window_bounds = array<i64: 16, 12>}, {pipeline_mode = #tpu.pipeline_mode<synchronous>, transform_indices = @transform_1, window_bounds = array<i64: 12, 32>}, {transform_indices = @transform_2, window_bounds = array<i64: 16, 32>}]} {
    %c0 = arith.constant 0 : index
    %c0_0 = arith.constant 0 : index
    %0 = vector.load %arg1[%c0, %c0_0] : memref<16x12xf32, #tpu.memory_space<vmem>>, vector<16x12xf32>
    %c0_1 = arith.constant 0 : index
    %c0_2 = arith.constant 0 : index
    %1 = vector.load %arg2[%c0_1, %c0_2] : memref<12x32xf32, #tpu.memory_space<vmem>>, vector<12x32xf32>
    %cst = arith.constant dense<0.000000e+00> : vector<16x32xf32>
    %2 = tpu.matmul %0, %1, %cst {dimension_numbers = #tpu.dot_dimension_numbers<[1], [0], [0], [1], [0, 0, 1, 1], [], []>} : vector<16x12xf32>, vector<12x32xf32>, vector<16x32xf32> -> vector<16x32xf32>
    %c0_3 = arith.constant 0 : index
    %c0_4 = arith.constant 0 : index
    %3 = vector.load %arg3[%c0_3, %c0_4] : memref<16x32xf32, #tpu.memory_space<vmem>>, vector<16x32xf32>
    tpu.vector_store %arg3[%c0_3, %c0_4], %2 {strides = array<i32>} : memref<16x32xf32, #tpu.memory_space<vmem>>, vector<16x32xf32>,
    return
  }
  func.func @transform_0(%arg0: i32) -> (i32, i32) {
    %c0_i32 = arith.constant 0 : i32
    %c0_i32_0 = arith.constant 0 : i32
    return %arg0, %c0_i32 : i32, i32
  }
  func.func @transform_1(%arg0: i32) -> (i32, i32) {
    %c0_i32 = arith.constant 0 : i32
    %c0_i32_0 = arith.constant 0 : i32
    %c0_i32_1 = arith.constant 0 : i32
    return %c0_i32, %c0_i32_0 : i32, i32
  }
  func.func @transform_2(%arg0: i32) -> (i32, i32) {
    %c0_i32 = arith.constant 0 : i32
    %c0_i32_0 = arith.constant 0 : i32
    return %arg0, %c0_i32 : i32, i32
  }
}

</mosaic_0001>

<bundles_post_ra>
// kernel: tpu_custom_call.1
= control target key start
LH: loop header
LB: loop body
LE: loop exit
PB: predicated region body
PF: predicated region fallthrough
CT: control target
= control target key end

     0   :  { %7 = vsyncpa [#allocation3], 0  ;;  %s231_s0 = inlined_call_operand.hbm [shape: f32[16,12], index: 0, kind: input, shape index: {}]   ;;  %s232_s1 = inlined_call_operand.hbm [shape: f32[12,32], index: 1, kind: input, shape index: {}]   ;;  %s233_s2 = inlined_call_operand.hbm [shape: f32[16,32], index: 2, kind: output, shape index: {}]  }
   0x1   :  { %8 = vsyncpa [#allocation6], 0 }
   0x2   :  { %9 = vsyncpa [#allocation4], 0  ;;  %s14_s11 = sshll.u32 %s231_s0, 4  ;;  %s193_s12 = smov [#allocation2]   ;;  %s15_s11 = int_to_ptr.hbm [resolvable:$true] %s14_s11 }
   0x3   :  { %s16_s13 = sshll.u32 %s193_s12, 4  ;;  %s27_s16 = sshll.u32 %s232_s1, 4  ;;  %s17_s13 = int_to_ptr.vmem [resolvable:$true] %s16_s13  ;;  %s28_s16 = int_to_ptr.hbm [resolvable:$true] %s27_s16 }
   0x4   :  { %s194_s17 = smov 128   ;;  %s195_s18 = smov 8  }
   0x5   :  { %22 = dma.hbm_to_vmem [thread:$0]  %s15_s11, 256, %s17_s13, [#allocation3], %s194_s17, %s194_s17, %s195_s18  }
   0x6   :  { %s196_s19 = smov [#allocation5]  }
   0x7   :  { %s29_s20 = sshll.u32 %s196_s19, 4  ;;  %s30_s20 = int_to_ptr.vmem [resolvable:$true] %s29_s20 }
   0x8   :  { %35 = dma.hbm_to_vmem [thread:$0]  %s28_s16, 256, %s30_s20, [#allocation6], %s194_s17, %s194_s17, %s195_s18  }
   0x9   :  { %187 = dma.done.wait [#allocation3], 256  }
   0xa   :  { %188 = vsyncadd [#allocation3], 4294967040 }
   0xb   :  { %189 = dma.done.wait [#allocation6], 256  }
   0xc   :  { %190 = vsyncadd [#allocation6], 4294967040  ;;  %vm55_vm0 = vcmask 1043456   ;;  %v47_v0 = vld [vmem:[#allocation5 + $0x8] sm:$0xf]  ;;  %v46_v1 = vld [vmem:[#allocation5] sm:$0xff] }
   0xd   :  { %105 = vmatpush.msk.msra.mxu0 %vm55_vm0, %v47_v0  ;;  %108 = vmatpush.msk.msra.mxu1 %vm55_vm0, %v47_v0  ;;  %v44_v2 = vld [vmem:[#allocation2] sm:$0xff]  ;;  %vm48_vm1 = vcmask 97280   ;;  %v45_v3 = vld [vmem:[#allocation2 + $0x8] sm:$0xff]  ;;  %s197_s0 = smov [#allocation7]   ;;  %s91_s23 = sshll.u32 %s233_s2, 4  ;;  %vm82_vm2 = vcmask 261120   ;;  %s92_s23 = int_to_ptr.hbm [resolvable:$true] %s91_s23 }
   0xe   :  { %s89_s1 = sshll.u32 %s197_s0, 4  ;;  %s90_s1 = int_to_ptr.vmem [resolvable:$true] %s89_s1 }
   0xf   :  { %74 = vmatpush.msra.mxu0 %v46_v1  ;;  %109 = vmatpush.msra.mxu1 %v46_v1 }
  0x10   :  { %106 = vmatmul.msk.f32.vlgmr.msra.gmra.mxu0 %vm48_vm1, %v44_v2  ;;  %107 = vmatmul.msk.f32.vlgmr.msra.gmra.mxu1 %vm48_vm1, %v45_v3 }
  0x8d   :  { %v76_v4 = vpop.f32.mrf.mxu0  ;;  %v79_v5 = vpop.f32.mrf.mxu1 }
  0x8e   :  { %83 = vst.msk [vmem:[#allocation7] sm:$0xff] %vm82_vm2, %v76_v4 }
  0x8f   :  { %84 = vst.msk [vmem:[#allocation7 + $0x8] sm:$0xff] %vm82_vm2, %v79_v5 }
  0x90   :  { %97 = dma.vmem_to_hbm [thread:$0]  %s90_s1, 256, %s92_s23, [#allocation4], %s194_s17, %s194_s17, %s195_s18  }
  0x91   :  { %191 = dma.done.wait [#allocation4], 256  }
  0x92   :  { %192 = vsyncadd [#allocation4], 4294967040 }
  0x93   :  { %102 = vsyncpa [#allocation3], 1 }
  0x94   :  { %103 = vsyncpa [#allocation6], 1 }
  0x95   :  { %104 = vsyncpa [#allocation4], 1 }

</bundles_post_ra>
